<compile_context>
chip_gen: v6e
topology: v6e:2x2x1
jax: 0.10.0
libtpu: 0.0.40
codegen_flags: <defaults>
</compile_context>

<pallas_src>
import jax
import jax.numpy as jnp
from jax.experimental import pallas as pl
from jax.experimental.pallas import tpu as pltpu


_LANES = 512           # lane-dense block width (multiple of 128 lanes)
_SUBLANES = 8
_MAX_TILE_ROWS = 1024  # 1024 x 512 f32 = 2 MiB per array tile


def _cdiv(a, b):
    return -(-a // b)


def _round_up(a, b):
    return _cdiv(a, b) * b


def _plan(n):
    """Choose (rows, tile_rows, grid) for a flat element count n."""
    rows_min = _round_up(_cdiv(n, _LANES), _SUBLANES)
    grid = max(1, _cdiv(rows_min, _MAX_TILE_ROWS))
    # Force a 2-step grid only when each half is still large (>= 512 rows =
    # 1 MiB/array): that is when v7x's two TensorCores actually gain from the
    # split; smaller tensors stay single-step (pure overhead otherwise,
    # especially on single-TC v5e/v6e where the grid is a serial loop).
    if grid == 1 and rows_min >= 2 * 512:
        grid = 2
    tile_rows = _round_up(_cdiv(rows_min, grid), _SUBLANES)
    rows = grid * tile_rows
    return rows, tile_rows, grid


def _to_slab(x, rows, pad_value=0.0):
    """Flatten x (native dtype kept) into a lane-dense [rows, 512] slab."""
    n = x.size
    padded = rows * _LANES
    x = jnp.ravel(x)
    if padded != n:  # slow path only for ragged sizes; aligned case is a free reshape
        x = jnp.pad(x, (0, padded - n), constant_values=pad_value)
    return x.reshape(rows, _LANES)


def _exp_decay_kernel(t_ref, a_ref, b_ref, t1_ref, o_ref):
    # Upcast to f32 in-register (required on v5e: no bf16 VPU/EUP; free on
    # v6e/v7x).  Divide + exp + mul + sub all sit far below the load-slot /
    # EUP ceiling for this HBM-bound kernel.
    t = t_ref[...].astype(jnp.float32)
    a = a_ref[...].astype(jnp.float32)
    b = b_ref[...].astype(jnp.float32)
    t1 = t1_ref[...].astype(jnp.float32)
    o_ref[...] = (a - b * jnp.exp(-t / t1)).astype(o_ref.dtype)


def make_exp_decay(A, B, t1):
    """Build forward(t) = A - B*exp(-t/t1) with parameter prep hoisted out of
    the per-call path (A, B, t1 are static parameters of the module)."""
    assert A.shape == B.shape == t1.shape
    shape = A.shape
    n = int(A.size)
    rows, tile_rows, grid = _plan(n)
    needs_pad = (rows * _LANES != n)

    # One-time parameter prep (done at "module init" time, not per forward).
    a_slab = _to_slab(A, rows, pad_value=0.0)
    b_slab = _to_slab(B, rows, pad_value=0.0)
    t1_slab = _to_slab(t1, rows, pad_value=1.0)  # pad=1 avoids 0/0 in pad region

    out_dtype = jnp.result_type(A.dtype, B.dtype, t1.dtype)

    spec = pl.BlockSpec((tile_rows, _LANES), lambda i: (i, 0))
    call = pl.pallas_call(
        _exp_decay_kernel,
        out_shape=jax.ShapeDtypeStruct((rows, _LANES), out_dtype),
        grid_spec=pltpu.PrefetchScalarGridSpec(
            num_scalar_prefetch=0,
            grid=(grid,),
            in_specs=[spec, spec, spec, spec],
            out_specs=spec,
        ),
        compiler_params=pltpu.CompilerParams(
            dimension_semantics=("parallel",),
            vmem_limit_bytes=32 * 1024 * 1024,  # ~20 MiB actual footprint
        ),
    )

    @jax.jit
    def forward(t):
        assert t.shape == shape, f"expected t of shape {shape}, got {t.shape}"
        t_slab = _to_slab(t, rows, pad_value=0.0)
        out = call(t_slab, a_slab, b_slab, t1_slab)
        if needs_pad:
            return out.reshape(-1)[:n].reshape(shape)
        return out.reshape(shape)  # no-pad fast path: free reshape, no slice

    return forward


if __name__ == "__main__":
    key = jax.random.PRNGKey(0)

    # (64, 128): aligned no-pad fast path (8192 elems = 16 full 512-lane rows).
    # (64, 257): ragged shape exercising the flatten/pad/un-pad path.
    # (8, 128):  tiny shape (single grid step, no forced split).
    for shape in [(64, 128), (64, 257), (8, 128)]:
        # Deterministic parameter init matching the PyTorch module __init__.
        A = jnp.ones(shape, dtype=jnp.float32)
        B = jnp.ones(shape, dtype=jnp.float32)
        t1 = jnp.ones(shape, dtype=jnp.float32) * 2000.0

        forward = make_exp_decay(A, B, t1)

        key, sub = jax.random.split(key)
        t = jax.random.uniform(sub, shape, dtype=jnp.float32,
                               minval=0.0, maxval=100.0)

        out = jax.block_until_ready(forward(t))

        # Reference check in plain JAX (same math as the PyTorch forward).
        ref = A - B * jnp.exp(-t / t1)
        assert jnp.allclose(out, ref, atol=1e-6, rtol=1e-6), \
            f"mismatch vs reference for shape {shape}"

    print("KERNEL_OK")
</pallas_src>

<mosaic_0001>
module attributes {stable_mosaic.version = 11 : i64} {
  func.func @_exp_decay_kernel(%arg0: i32, %arg1: memref<16x512xf32, #tpu.memory_space<vmem>>, %arg2: memref<16x512xf32, #tpu.memory_space<vmem>>, %arg3: memref<16x512xf32, #tpu.memory_space<vmem>>, %arg4: memref<16x512xf32, #tpu.memory_space<vmem>>, %arg5: memref<16x512xf32, #tpu.memory_space<vmem>>) attributes {dimension_semantics = [#tpu.dimension_semantics<parallel>], iteration_bounds = array<i64: 1>, scalar_prefetch = 0 : i64, scratch_operands = 0 : i64, tpu.core_type = #tpu.core_type<tc>, window_params = [{transform_indices = @transform_0, window_bounds = array<i64: 16, 512>}, {transform_indices = @transform_1, window_bounds = array<i64: 16, 512>}, {transform_indices = @transform_2, window_bounds = array<i64: 16, 512>}, {transform_indices = @transform_3, window_bounds = array<i64: 16, 512>}, {transform_indices = @transform_4, window_bounds = array<i64: 16, 512>}]} {
    %c0 = arith.constant 0 : index
    %c0_0 = arith.constant 0 : index
    %0 = vector.load %arg1[%c0, %c0_0] : memref<16x512xf32, #tpu.memory_space<vmem>>, vector<16x512xf32>
    %c0_1 = arith.constant 0 : index
    %c0_2 = arith.constant 0 : index
    %1 = vector.load %arg2[%c0_1, %c0_2] : memref<16x512xf32, #tpu.memory_space<vmem>>, vector<16x512xf32>
    %c0_3 = arith.constant 0 : index
    %c0_4 = arith.constant 0 : index
    %2 = vector.load %arg3[%c0_3, %c0_4] : memref<16x512xf32, #tpu.memory_space<vmem>>, vector<16x512xf32>
    %c0_5 = arith.constant 0 : index
    %c0_6 = arith.constant 0 : index
    %3 = vector.load %arg4[%c0_5, %c0_6] : memref<16x512xf32, #tpu.memory_space<vmem>>, vector<16x512xf32>
    %cst = arith.constant 0.000000e+00 : f32
    %4 = vector.broadcast %cst : f32 to vector<16x512xf32>
    %5 = arith.subf %4, %0 : vector<16x512xf32>
    %6 = arith.divf %5, %3 : vector<16x512xf32>
    %7 = math.exp %6 : vector<16x512xf32>
    %8 = arith.mulf %2, %7 : vector<16x512xf32>
    %9 = arith.subf %1, %8 : vector<16x512xf32>
    %c0_7 = arith.constant 0 : index
    %c0_8 = arith.constant 0 : index
    %10 = vector.load %arg5[%c0_7, %c0_8] : memref<16x512xf32, #tpu.memory_space<vmem>>, vector<16x512xf32>
    tpu.vector_store %arg5[%c0_7, %c0_8], %9 {strides = array<i32>} : memref<16x512xf32, #tpu.memory_space<vmem>>, vector<16x512xf32>,
    return
  }
  func.func @transform_0(%arg0: i32) -> (i32, i32) {
    %c0_i32 = arith.constant 0 : i32
    %c0_i32_0 = arith.constant 0 : i32
    return %arg0, %c0_i32 : i32, i32
  }
  func.func @transform_1(%arg0: i32) -> (i32, i32) {
    %c0_i32 = arith.constant 0 : i32
    %c0_i32_0 = arith.constant 0 : i32
    return %arg0, %c0_i32 : i32, i32
  }
  func.func @transform_2(%arg0: i32) -> (i32, i32) {
    %c0_i32 = arith.constant 0 : i32
    %c0_i32_0 = arith.constant 0 : i32
    return %arg0, %c0_i32 : i32, i32
  }
  func.func @transform_3(%arg0: i32) -> (i32, i32) {
    %c0_i32 = arith.constant 0 : i32
    %c0_i32_0 = arith.constant 0 : i32
    return %arg0, %c0_i32 : i32, i32
  }
  func.func @transform_4(%arg0: i32) -> (i32, i32) {
    %c0_i32 = arith.constant 0 : i32
    %c0_i32_0 = arith.constant 0 : i32
    return %arg0, %c0_i32 : i32, i32
  }
}

</mosaic_0001>

<bundles_post_ra>
// kernel: forward.1
= control target key start
LH: loop header
LB: loop body
LE: loop exit
PB: predicated region body
PF: predicated region fallthrough
CT: control target
= control target key end

     0   :  { %s294_s3 = inlined_call_operand.vmem [shape: f32[16,512], index: 3, kind: input, shape index: {}]   ;;  %s295_s0 = inlined_call_operand.vmem [shape: f32[16,512], index: 0, kind: input, shape index: {}]   ;;  %s296_s2 = inlined_call_operand.vmem [shape: f32[16,512], index: 2, kind: input, shape index: {}, may-alias: {1,2}]   ;;  %s297_s1 = inlined_call_operand.vmem [shape: f32[16,512], index: 1, kind: input, shape index: {}, may-alias: {1,2}]   ;;  %s298_s4 = inlined_call_operand.vmem [shape: f32[16,512], index: 4, kind: output, shape index: {}]  }
   0x1   :  { %v41_v0 = vld [vmem:[%s294_s3] sm:$0xff]  ;;  %v42_v1 = vld [vmem:[%s294_s3 + $0x8] sm:$0xff]  ;;  %v43_v2 = vld [vmem:[%s294_s3 + $0x10] sm:$0xff] }
   0x2   :  { %117 = vrcp.f32 %v41_v0  ;;  %v44_v3 = vld [vmem:[%s294_s3 + $0x18] sm:$0xff]  ;;  %v45_v4 = vld [vmem:[%s294_s3 + $0x20] sm:$0xff]  ;;  %v46_v5 = vld [vmem:[%s294_s3 + $0x28] sm:$0xff] }
   0x3   :  { %119 = vrcp.f32 %v42_v1  ;;  %v17_v6 = vld [vmem:[%s295_s0] sm:$0xff]  ;;  %v47_v7 = vld [vmem:[%s294_s3 + $0x30] sm:$0xff]  ;;  %v18_v8 = vld [vmem:[%s295_s0 + $0x8] sm:$0xff] }
   0x4   :  { %121 = vrcp.f32 %v43_v2  ;;  %v48_v9 = vld [vmem:[%s294_s3 + $0x38] sm:$0xff]  ;;  %v19_v10 = vld [vmem:[%s295_s0 + $0x10] sm:$0xff]  ;;  %v49_v11 = vsub.f32 0.0, %v17_v6  ;;  %v50_v12 = vsub.f32 0.0, %v18_v8  ;;  %v21_v15 = vld [vmem:[%s295_s0 + $0x20] sm:$0xff] }
   0x5   :  { %123 = vrcp.f32 %v44_v3  ;;  %v20_v13 = vld [vmem:[%s295_s0 + $0x18] sm:$0xff]  ;;  %v51_v14 = vsub.f32 0.0, %v19_v10  ;;  %v22_v17 = vld [vmem:[%s295_s0 + $0x28] sm:$0xff]  ;;  %v53_v23 = vsub.f32 0.0, %v21_v15  ;;  %v23_v24 = vld [vmem:[%s295_s0 + $0x30] sm:$0xff] }
   0x6   :  { %125 = vrcp.f32 %v45_v4  ;;  %v52_v20 = vsub.f32 0.0, %v20_v13  ;;  %v54_v27 = vsub.f32 0.0, %v22_v17  ;;  %v24_v28 = vld [vmem:[%s295_s0 + $0x38] sm:$0xff]  ;;  %v55_v34 = vsub.f32 0.0, %v23_v24  ;;  %v33_v48 = vld [vmem:[%s296_s2] sm:$0xff]  ;;  %v34_v49 = vld [vmem:[%s296_s2 + $0x8] sm:$0xff] }
   0x7   :  { %127 = vrcp.f32 %v46_v5  ;;  %v56_v37 = vsub.f32 0.0, %v24_v28  ;;  %v25_v51 = vld [vmem:[%s297_s1] sm:$0xff]  ;;  %v35_v52 = vld [vmem:[%s296_s2 + $0x10] sm:$0xff]  ;;  %v26_v55 = vld [vmem:[%s297_s1 + $0x8] sm:$0xff] }
   0x8   :  { %129 = vrcp.f32 %v47_v7  ;;  %v27_v58 = vld [vmem:[%s297_s1 + $0x10] sm:$0xff]  ;;  %v36_v59 = vld [vmem:[%s296_s2 + $0x18] sm:$0xff]  ;;  %v37_v62 = vld [vmem:[%s296_s2 + $0x20] sm:$0xff] }
   0x9   :  { %131 = vrcp.f32 %v48_v9  ;;  %v28_v1 = vld [vmem:[%s297_s1 + $0x18] sm:$0xff]  ;;  %v38_v2 = vld [vmem:[%s296_s2 + $0x28] sm:$0xff]  ;;  %v29_v6 = vld [vmem:[%s297_s1 + $0x20] sm:$0xff] }
   0xa   :  { %v30_v9 = vld [vmem:[%s297_s1 + $0x28] sm:$0xff]  ;;  %v39_v10 = vld [vmem:[%s296_s2 + $0x30] sm:$0xff]  ;;  %v40_v13 = vld [vmem:[%s296_s2 + $0x38] sm:$0xff] }
   0xf   :  { %v118_v16 = vpop.eup %117 }
  0x10   :  { %v120_v18 = vpop.eup %119  ;;  %v58_v19 = vmul.f32 %v118_v16, %v49_v11  ;;  %v31_v16 = vld [vmem:[%s297_s1 + $0x30] sm:$0xff] }
  0x11   :  { %v122_v21 = vpop.eup %121  ;;  %v60_v22 = vmul.f32 %v120_v18, %v50_v12 }
  0x12   :  { %v73_v25 = vmul.f32 1.442695, %v58_v19  ;;  %v62_v26 = vmul.f32 %v122_v21, %v51_v14  ;;  %v124_v29 = vpop.eup %123 }
  0x13   :  { %v75_v30 = vmul.f32 1.442695, %v60_v22  ;;  %v126_v31 = vpop.eup %125  ;;  %v64_v33 = vmul.f32 %v124_v29, %v52_v20  ;;  %v32_v20 = vld [vmem:[%s297_s1 + $0x38] sm:$0xff] }
  0x14   :  { %133 = vpow2.f32 %v73_v25  ;;  %v77_v32 = vmul.f32 1.442695, %v62_v26  ;;  %v128_v35 = vpop.eup %127  ;;  %v66_v36 = vmul.f32 %v126_v31, %v53_v23 }
  0x15   :  { %135 = vpow2.f32 %v75_v30  ;;  %v79_v38 = vmul.f32 1.442695, %v64_v33  ;;  %v68_v39 = vmul.f32 %v128_v35, %v54_v27  ;;  %v130_v40 = vpop.eup %129 }
  0x16   :  { %137 = vpow2.f32 %v77_v32  ;;  %v81_v41 = vmul.f32 1.442695, %v66_v36  ;;  %v132_v42 = vpop.eup %131  ;;  %v70_v44 = vmul.f32 %v130_v40, %v55_v34 }
  0x17   :  { %139 = vpow2.f32 %v79_v38  ;;  %v83_v43 = vmul.f32 1.442695, %v68_v39  ;;  %v72_v45 = vmul.f32 %v132_v42, %v56_v37 }
  0x18   :  { %141 = vpow2.f32 %v81_v41  ;;  %v85_v46 = vmul.f32 1.442695, %v70_v44 }
  0x19   :  { %143 = vpow2.f32 %v83_v43  ;;  %v87_v47 = vmul.f32 1.442695, %v72_v45 }
  0x1a   :  { %145 = vpow2.f32 %v85_v46 }
  0x1b   :  { %147 = vpow2.f32 %v87_v47 }
  0x21   :  { %v134_v50 = vpop.eup %133 }
  0x22   :  { %v136_v53 = vpop.eup %135  ;;  %v89_v54 = vmul.f32 %v134_v50, %v33_v48 }
  0x23   :  { %v138_v56 = vpop.eup %137  ;;  %v90_v57 = vmul.f32 %v136_v53, %v34_v49 }
  0x24   :  { %v97_v60 = vsub.f32 %v25_v51, %v89_v54  ;;  %v91_v61 = vmul.f32 %v138_v56, %v35_v52  ;;  %v140_v63 = vpop.eup %139 }
  0x25   :  { %v98_v0 = vsub.f32 %v26_v55, %v90_v57  ;;  %v142_v3 = vpop.eup %141  ;;  %v92_v5 = vmul.f32 %v140_v63, %v36_v59 }
  0x26   :  { %105 = vst [vmem:[%s298_s4] sm:$0xff] %v97_v60  ;;  %v99_v4 = vsub.f32 %v27_v58, %v91_v61  ;;  %v144_v7 = vpop.eup %143  ;;  %v93_v8 = vmul.f32 %v142_v3, %v37_v62 }
  0x27   :  { %106 = vst [vmem:[%s298_s4 + $0x8] sm:$0xff] %v98_v0  ;;  %v100_v11 = vsub.f32 %v28_v1, %v92_v5  ;;  %v94_v12 = vmul.f32 %v144_v7, %v38_v2  ;;  %v146_v14 = vpop.eup %145 }
  0x28   :  { %107 = vst [vmem:[%s298_s4 + $0x10] sm:$0xff] %v99_v4  ;;  %v101_v15 = vsub.f32 %v29_v6, %v93_v8  ;;  %v148_v17 = vpop.eup %147  ;;  %v95_v19 = vmul.f32 %v146_v14, %v39_v10 }
  0x29   :  { %108 = vst [vmem:[%s298_s4 + $0x18] sm:$0xff] %v100_v11  ;;  %v102_v18 = vsub.f32 %v30_v9, %v94_v12  ;;  %v96_v21 = vmul.f32 %v148_v17, %v40_v13 }
  0x2a   :  { %109 = vst [vmem:[%s298_s4 + $0x20] sm:$0xff] %v101_v15  ;;  %v103_v22 = vsub.f32 %v31_v16, %v95_v19 }
  0x2b   :  { %110 = vst [vmem:[%s298_s4 + $0x28] sm:$0xff] %v102_v18  ;;  %v104_v23 = vsub.f32 %v32_v20, %v96_v21 }
  0x2c   :  { %111 = vst [vmem:[%s298_s4 + $0x30] sm:$0xff] %v103_v22 }
  0x2d   :  { %112 = vst [vmem:[%s298_s4 + $0x38] sm:$0xff] %v104_v23 }

</bundles_post_ra>
